<compile_context>
chip_gen: v7x
topology: tpu7x:2x2x1
jax: 0.10.0
libtpu: 0.0.40
codegen_flags: <defaults>
</compile_context>

<pallas_src>
import math
import numpy as np
import jax
import jax.numpy as jnp
from jax.experimental import pallas as pl
from jax.experimental.pallas import tpu as pltpu


def ada_mean_only_in_kernel(x_ref, side_ref, out_ref):
    # Per-grid-step shapes:
    #   x_ref    : (TM, HW)  activation rows, spatial (H*W) on lanes
    #   side_ref : (TM, 2)   col 0 = (Linear(style)*scale) per row,
    #                        col 1 = learned mean parameter per row
    #   out_ref  : (TM, HW)
    x = x_ref[...].astype(jnp.float32)                    # f32 math even for bf16 I/O
    hw = x.shape[-1]
    m = jnp.sum(x, axis=-1, keepdims=True) * (1.0 / hw)   # lane reduce + const mul
    side = side_ref[...]                                  # (TM, 2) f32
    out = (x - m) * side[:, 0:1] + side[:, 1:2]           # (TM,1) broadcasts over lanes
    out_ref[...] = out.astype(out_ref.dtype)


def ada_mean_only_in(x_nchw, style, w_mod, b_mod, mean_param, scale,
                     *, max_tile_bytes=4 << 20):
    B, C, H, W = x_nchw.shape
    HW = H * W
    R = B * C
    x = x_nchw.reshape(R, HW)                              # free reshape, no transpose

    # Hoisted modulation Linear (one batched matmul), scale folded into weights.
    mstyle = (style @ (w_mod.T * scale) + b_mod * scale).astype(jnp.float32)   # (B, C)
    mean_row = jnp.broadcast_to(mean_param.reshape(1, C).astype(jnp.float32), (B, C))
    side = jnp.stack([mstyle, mean_row], axis=-1).reshape(R, 2)                # (R, 2)

    # Pad rows up to a multiple of 8 (sublane) so blocks tile cleanly.
    R_pad = ((R + 7) // 8) * 8
    if R_pad != R:
        x = jnp.pad(x, ((0, R_pad - R), (0, 0)))
        side = jnp.pad(side, ((0, R_pad - R), (0, 0)))

    # Row-tile size: largest multiple of 8 dividing R_pad with tile <= max_tile_bytes.
    itemsize = jnp.dtype(x_nchw.dtype).itemsize
    cap_rows = max(8, (max_tile_bytes // max(1, HW * itemsize)) // 8 * 8)
    tm = min(R_pad, cap_rows)
    while R_pad % tm != 0:
        tm -= 8
    grid = (R_pad // tm,)

    out = pl.pallas_call(
        ada_mean_only_in_kernel,
        out_shape=jax.ShapeDtypeStruct((R_pad, HW), x_nchw.dtype),
        grid_spec=pltpu.PrefetchScalarGridSpec(
            num_scalar_prefetch=0,
            grid=grid,
            in_specs=[
                pl.BlockSpec((tm, HW), lambda i: (i, 0)),
                pl.BlockSpec((tm, 2), lambda i: (i, 0)),
            ],
            out_specs=pl.BlockSpec((tm, HW), lambda i: (i, 0)),
        ),
        compiler_params=pltpu.CompilerParams(
            dimension_semantics=("parallel",),
            # 2 buffers x (in + out) tiles at <=4 MiB each stays well under this;
            # 40 MiB is below physical VMEM on every generation (incl. v7x 64 MiB).
            vmem_limit_bytes=40 << 20,
        ),
    )(x, side)
    return out[:R].reshape(B, C, H, W)


if __name__ == "__main__":
    # Small shapes consistent with the module
    B, C, S, H, W = 2, 4, 8, 16, 16                        # num_features=4, style_dim=8
    scale = 1.0 / math.sqrt(C * 3 ** 2)

    key = jax.random.PRNGKey(0)
    k1, k2, k3, k4, k5 = jax.random.split(key, 5)

    x = jax.random.normal(k1, (B, C, H, W), jnp.float32)
    style = jax.random.normal(k2, (B, S), jnp.float32)

    # modulation Linear(style_dim -> num_features): bias init 1.0 (+ small noise
    # so the bias path is actually exercised)
    w_mod = jax.random.normal(k3, (C, S), jnp.float32) * math.sqrt(1.0 / S)
    b_mod = 1.0 + 0.1 * jax.random.normal(k4, (C,), jnp.float32)
    # learned mean parameter (zeros at init; random here to exercise the add)
    mean_param = 0.1 * jax.random.normal(k5, (1, C, 1, 1), jnp.float32)

    out = ada_mean_only_in(x, style, w_mod, b_mod, mean_param, scale)
    out = jax.block_until_ready(out)

    # pure-JAX reference of the PyTorch forward (in_var / eps are unused there)
    in_mean = jnp.mean(x, axis=(2, 3), keepdims=True)
    mstyle_ref = (style @ w_mod.T + b_mod) * scale
    z_ref = (x - in_mean) * mstyle_ref[:, :, None, None] + mean_param
    z_ref = jax.block_until_ready(z_ref)

    np.testing.assert_allclose(np.asarray(out), np.asarray(z_ref),
                               rtol=1e-5, atol=1e-5)
    print("KERNEL_OK")
</pallas_src>

<mosaic_0001>
module attributes {stable_mosaic.version = 11 : i64} {
  func.func @ada_mean_only_in_kernel(%arg0: i32, %arg1: memref<8x256xf32, #tpu.memory_space<vmem>>, %arg2: memref<8x2xf32, #tpu.memory_space<vmem>>, %arg3: memref<8x256xf32, #tpu.memory_space<vmem>>) attributes {dimension_semantics = [#tpu.dimension_semantics<parallel>], iteration_bounds = array<i64: 1>, scalar_prefetch = 0 : i64, scratch_operands = 0 : i64, tpu.core_type = #tpu.core_type<tc>, window_params = [{transform_indices = @transform_0, window_bounds = array<i64: 8, 256>}, {transform_indices = @transform_1, window_bounds = array<i64: 8, 2>}, {transform_indices = @transform_2, window_bounds = array<i64: 8, 256>}]} {
    %c0 = arith.constant 0 : index
    %c0_0 = arith.constant 0 : index
    %0 = vector.load %arg1[%c0, %c0_0] : memref<8x256xf32, #tpu.memory_space<vmem>>, vector<8x256xf32>
    %cst = arith.constant dense<0.000000e+00> : vector<8xf32>
    %1 = vector.multi_reduction <add>, %0, %cst [1] : vector<8x256xf32> to vector<8xf32>
    %2 = vector.shape_cast %1 : vector<8xf32> to vector<8x1xf32>
    %cst_1 = arith.constant 3.906250e-03 : f32
    %3 = vector.broadcast %cst_1 : f32 to vector<8x1xf32>
    %4 = arith.mulf %2, %3 : vector<8x1xf32>
    %c0_2 = arith.constant 0 : index
    %c0_3 = arith.constant 0 : index
    %5 = vector.load %arg2[%c0_2, %c0_3] : memref<8x2xf32, #tpu.memory_space<vmem>>, vector<8x2xf32>
    %6 = vector.broadcast %4 : vector<8x1xf32> to vector<8x256xf32>
    %7 = arith.subf %0, %6 : vector<8x256xf32>
    %8 = vector.extract_strided_slice %5 {offsets = [0, 0], sizes = [8, 1], strides = [1, 1]} : vector<8x2xf32> to vector<8x1xf32>
    %9 = vector.broadcast %8 : vector<8x1xf32> to vector<8x256xf32>
    %10 = arith.mulf %7, %9 : vector<8x256xf32>
    %11 = vector.extract_strided_slice %5 {offsets = [0, 1], sizes = [8, 1], strides = [1, 1]} : vector<8x2xf32> to vector<8x1xf32>
    %12 = vector.broadcast %11 : vector<8x1xf32> to vector<8x256xf32>
    %13 = arith.addf %10, %12 : vector<8x256xf32>
    %c0_4 = arith.constant 0 : index
    %c0_5 = arith.constant 0 : index
    %14 = vector.load %arg3[%c0_4, %c0_5] : memref<8x256xf32, #tpu.memory_space<vmem>>, vector<8x256xf32>
    tpu.vector_store %arg3[%c0_4, %c0_5], %13 {strides = array<i32>} : memref<8x256xf32, #tpu.memory_space<vmem>>, vector<8x256xf32>,
    return
  }
  func.func @transform_0(%arg0: i32) -> (i32, i32) {
    %c0_i32 = arith.constant 0 : i32
    %c0_i32_0 = arith.constant 0 : i32
    return %arg0, %c0_i32 : i32, i32
  }
  func.func @transform_1(%arg0: i32) -> (i32, i32) {
    %c0_i32 = arith.constant 0 : i32
    %c0_i32_0 = arith.constant 0 : i32
    return %arg0, %c0_i32 : i32, i32
  }
  func.func @transform_2(%arg0: i32) -> (i32, i32) {
    %c0_i32 = arith.constant 0 : i32
    %c0_i32_0 = arith.constant 0 : i32
    return %arg0, %c0_i32 : i32, i32
  }
}

</mosaic_0001>

<bundles_post_ra>
// kernel: tpu_custom_call.1
= control target key start
LH: loop header
LB: loop body
LE: loop exit
PB: predicated region body
PF: predicated region fallthrough
CT: control target
= control target key end

     0   :  { %7 = vsyncpa [#allocation3], 0  ;;  %s164_s0 = inlined_call_operand.hbm [shape: f32[8,256], index: 0, kind: input, shape index: {}]   ;;  %s165_s1 = inlined_call_operand.vmem [shape: f32[8,2], index: 1, kind: input, shape index: {}]   ;;  %s166_s2 = inlined_call_operand.hbm [shape: f32[8,256], index: 2, kind: output, shape index: {}]  }
   0x1   :  { %8 = vsyncpa [#allocation4], 0  ;;  %s118_s9 = smov [#allocation2]   ;;  %s70_s13 = scalar_lea.hbm %s164_s0, 256 }
   0x2   :  { %s15_s10 = sshll.u32 %s118_s9, 4  ;;  %p71_p0 = scmp.ne.s32.totalorder %s164_s0, %s70_s13  ;;  %s16_s10 = int_to_ptr.vmem [resolvable:$true] %s15_s10 }
   0x3   :  { %p74_p1 = scmp.lt.u32.totalorder %s70_s13, %s164_s0 }
   0x5   :  { %p76_p2 = pnand %p74_p1, %p71_p0 }
   0x7   :  { %79 = shalt.err (!%p76_p2)
}
   0x8   :  { %s80_s18 = scalar_lea.vmem %s16_s10, 256  ;;  %p85_p4 = scmp.lt.s32.totalorder %s16_s10, %s16_s10 }
   0x9   :  { %p81_p3 = scmp.ne.s32.totalorder %s16_s10, %s80_s18  ;;  %p86_p5 = scmp.lt.s32.totalorder %s80_s18, %s80_s18 }
   0xb   :  { %p87_p6 = por %p86_p5, %p85_p4 }
   0xd   :  { %p88_p7 = pnand %p87_p6, %p81_p3 }
   0xf   :  { %91 = shalt.err (!%p88_p7)
}
  0x10   :  { %18 = dma.hbm_to_vmem [thread:$0]  %s164_s0, 256, %s16_s10, [#allocation3]  }
  0x11   :  { %114 = dma.done.wait [#allocation3], 256  }
  0x12   :  { %115 = vsyncadd [#allocation3], 4294967040  ;;  %v119_v0 = vmov 0   ;;  %v120_v1 = vmov 1   ;;  %v24_v2 = vld [vmem:[#allocation2] sm:$0xff]  ;;  %v25_v3 = vld [vmem:[#allocation2 + $0x8] sm:$0xff] }
  0x13   :  { %67 = vset.pattern.permute.xlu0 %v119_v0  ;;  %68 = vset.pattern.permute.xlu1 %v120_v1  ;;  %v30_v4 = vld [vmem:[%s165_s1] sm:$0xff]  ;;  %v26_v5 = vadd.f32 %v25_v3, %v24_v2  ;;  %s121_s0 = smov [#allocation5]  }
  0x14   :  { %41 = vperm.xlu1 %68, %v30_v4   ;;  %s54_s23 = sshll.u32 %s121_s0, 4  ;;  %s55_s23 = int_to_ptr.vmem [resolvable:$true] %s54_s23 }
  0x15   :  { %27 = vadd.xlane.f32.xlu0 %v26_v5  ;;  %s92_s1 = scalar_lea.vmem %s55_s23, 256  ;;  %p97_p9 = scmp.lt.s32.totalorder %s55_s23, %s55_s23 }
  0x16   :  { %p93_p8 = scmp.ne.s32.totalorder %s55_s23, %s92_s1  ;;  %p98_p10 = scmp.lt.s32.totalorder %s92_s1, %s92_s1 }
  0x18   :  { %p99_p11 = por %p98_p10, %p97_p9 }
  0x1a   :  { %p100_p12 = pnand %p99_p11, %p93_p8 }
  0x2b   :  { %35 = vperm.xlu0 %67, %v30_v4  }
  0x2f   :  { %69 = vset.pattern.permute.xlu0 %v120_v1 }
  0x93   :  { %v42_v11 = vpop.permute.xlu1 %41 }
  0xa2   :  { %v28_v6 = vpop.xlane.xlu0 %27 }
  0xa3   :  { %v29_v7 = vmul.f32 0.00390625, %v28_v6 }
  0xa5   :  { %v31_v8 = vsub.f32 %v24_v2, %v29_v7  ;;  %v32_v9 = vsub.f32 %v25_v3, %v29_v7 }
  0xaa   :  { %v36_v10 = vpop.permute.xlu0 %35 }
  0xab   :  { %v38_v12 = vmul.f32 %v36_v10, %v31_v8  ;;  %v39_v13 = vmul.f32 %v36_v10, %v32_v9 }
  0xad   :  { %v44_v14 = vadd.f32 %v42_v11, %v38_v12  ;;  %v45_v15 = vadd.f32 %v42_v11, %v39_v13 }
  0xaf   :  { %46 = vst [vmem:[#allocation5] sm:$0xff] %v44_v14  ;;  %47 = vst [vmem:[#allocation5 + $0x8] sm:$0xff] %v45_v15 }
  0xb0   :  { %103 = shalt.err (!%p100_p12)
}
  0xb1   :  { %s104_s26 = scalar_lea.hbm %s166_s2, 256 }
  0xb2   :  { %p105_p13 = scmp.ne.s32.totalorder %s166_s2, %s104_s26  ;;  %p108_p0 = scmp.lt.u32.totalorder %s104_s26, %s166_s2 }
  0xb4   :  { %p110_p1 = pnand %p108_p0, %p105_p13 }
  0xb6   :  { %113 = shalt.err (!%p110_p1)
}
  0xb7   :  { %57 = dma.vmem_to_hbm [thread:$0]  %s55_s23, 256, %s166_s2, [#allocation4]  }
  0xb8   :  { %116 = dma.done.wait [#allocation4], 256  }
  0xb9   :  { %117 = vsyncadd [#allocation4], 4294967040 }
  0xba   :  { %61 = vsyncpa [#allocation3], 1 }
  0xbb   :  { %62 = vsyncpa [#allocation4], 1 }

</bundles_post_ra>
